<compile_context>
chip_gen: v7x
topology: tpu7x:2x2x1
jax: 0.10.0
libtpu: 0.0.40
codegen_flags: <defaults>
</compile_context>

<pallas_src>
import jax
import jax.numpy as jnp
from jax.experimental import pallas as pl
from jax.experimental.pallas import tpu as pltpu


def _normalize_kernel(stats_ref, x_ref, o_ref):
    # stats_ref: (rows_tile, 2) f32 -- column 0 = per-row mean, column 1 = 1/std.
    # x_ref / o_ref: (rows_tile, cols_tile) blocks of the flattened (N*C, H*W) slab.
    st = stats_ref[...]
    m = st[:, 0:1]                     # (rows, 1) -> broadcasts across lanes
    s = st[:, 1:2]
    x = x_ref[...].astype(jnp.float32)
    o_ref[...] = ((x - m) * s).astype(o_ref.dtype)


def _tpu_vmem_bytes(default=64 << 20):
    """Best-effort per-core VMEM capacity query (conservative default: 64 MiB)."""
    try:
        info = pltpu.get_tpu_info()
        cap = getattr(info, "vmem_capacity_bytes", None)
        if cap:
            return int(cap)
    except Exception:
        pass
    return default


def _pick_tiles(rows_total, cols_total, itemsize, *, target_bytes, min_row_blocks=1):
    """Lane-dense, sublane-aligned, ~target_bytes blocks.

    Prefers cols_tile == full row (one contiguous HBM transfer per block) and
    only narrows columns when even a minimal row stripe exceeds the budget.
    Ragged last blocks are allowed (Pallas masks them), so awkward shapes do
    not collapse the tiles.
    """
    # dtype-aware sublane packing: 8 rows for f32, 16 for bf16, 32 for int8/fp8.
    sub = max(8, 32 // max(1, itemsize))
    min_rows = min(rows_total, sub)

    if cols_total <= 128 or min_rows * cols_total * itemsize <= target_bytes:
        cols = cols_total                                  # full-row contiguous DMA
    else:
        cols = (target_bytes // (min_rows * itemsize)) // 128 * 128
        cols = int(max(128, min(cols, cols_total)))        # multiple of 128 -> legal

    rows = max(1, target_bytes // (cols * itemsize))
    rows = min(rows, rows_total)
    if rows < rows_total:
        # Partial-row block: keep it a multiple of the native packing.
        rows = max(sub, (rows // sub) * sub) if rows_total >= sub else rows_total
    # else: full-dim block is always legal, keep it.

    # Optionally guarantee >= min_row_blocks row-blocks (v7x: feed both TCs).
    if min_row_blocks > 1 and rows_total >= sub and pl.cdiv(rows_total, rows) < min_row_blocks:
        want = pl.cdiv(rows_total, min_row_blocks)
        want = ((want + sub - 1) // sub) * sub
        if 0 < want < rows_total:
            rows = want
    return int(rows), int(cols)


def normalize_by_channel_mean_std(x, mean, std):
    """(x - mean[None, :, None, None]) / std[None, :, None, None] via Pallas."""
    N, C, H, W = x.shape
    R, L = N * C, H * W
    itemsize = x.dtype.itemsize

    # Per-row (= per (n, c)) stats in f32, packed into one (R, 2) array so each
    # row-block needs a single tiny stats DMA. The divide is replaced with a
    # precomputed reciprocal (~1 ulp difference vs a true divide).
    mean_rows = jnp.tile(mean.astype(jnp.float32), N)           # row r -> channel r % C
    inv_std_rows = jnp.tile(1.0 / std.astype(jnp.float32), N)
    stats = jnp.stack([mean_rows, inv_std_rows], axis=-1)       # (R, 2) f32

    x2 = x.reshape(R, L)   # free reshape: NCHW is contiguous; H*W -> lane axis

    # Generation-aware budgeting: big (~8 MiB) blocks on v5e/v6e (128 MiB VMEM),
    # ~4 MiB blocks and a >=2-block grid on v7x (64 MiB VMEM, 2 TensorCores).
    vmem_cap = _tpu_vmem_bytes()
    small_vmem = vmem_cap <= (96 << 20)                          # v7x-like
    target_bytes = (4 << 20) if small_vmem else (8 << 20)
    min_row_blocks = 2 if (small_vmem and R * L * itemsize > (1 << 20)) else 1

    rows_tile, cols_tile = _pick_tiles(
        R, L, itemsize, target_bytes=target_bytes, min_row_blocks=min_row_blocks)
    grid = (pl.cdiv(R, rows_tile), pl.cdiv(L, cols_tile))

    # VMEM limit from actual usage: double-buffered x + out blocks + stats + slack.
    block_bytes = rows_tile * cols_tile * itemsize
    vmem_needed = 2 * (2 * block_bytes + rows_tile * 2 * 4) + (2 << 20)
    vmem_limit = int(min(max(vmem_needed, 16 << 20), (vmem_cap * 3) // 4))

    out2 = pl.pallas_call(
        _normalize_kernel,
        out_shape=jax.ShapeDtypeStruct((R, L), x.dtype),
        grid_spec=pltpu.PrefetchScalarGridSpec(
            num_scalar_prefetch=0,
            grid=grid,
            in_specs=[
                pl.BlockSpec((rows_tile, 2), lambda i, j: (i, 0)),
                pl.BlockSpec((rows_tile, cols_tile), lambda i, j: (i, j)),
            ],
            out_specs=pl.BlockSpec((rows_tile, cols_tile), lambda i, j: (i, j)),
        ),
        compiler_params=pltpu.CompilerParams(
            dimension_semantics=("parallel", "parallel"),
            vmem_limit_bytes=vmem_limit,
        ),
    )(stats, x2)
    return out2.reshape(N, C, H, W)


if __name__ == "__main__":
    key = jax.random.PRNGKey(0)
    N, C, H, W = 2, 4, 16, 16

    # Module buffers: per-channel mean/std of shape (C,)
    mean = jnp.array([0.485, 0.456, 0.406, 0.5][:C], dtype=jnp.float32)
    std = jnp.array([0.229, 0.224, 0.225, 0.25][:C], dtype=jnp.float32)

    x = jax.random.uniform(key, (N, C, H, W), dtype=jnp.float32)

    out = normalize_by_channel_mean_std(x, mean, std)
    out = jax.block_until_ready(out)

    # Reference (same semantics as the PyTorch normalize_fn)
    ref = (x - mean[None, :, None, None]) / std[None, :, None, None]
    assert out.shape == x.shape and out.dtype == x.dtype
    assert jnp.allclose(out, ref, atol=1e-6, rtol=1e-5)

    print("KERNEL_OK")
</pallas_src>

<mosaic_0001>
module attributes {stable_mosaic.version = 11 : i64} {
  func.func @_normalize_kernel(%arg0: i32, %arg1: i32, %arg2: memref<8x2xf32, #tpu.memory_space<vmem>>, %arg3: memref<8x256xf32, #tpu.memory_space<vmem>>, %arg4: memref<8x256xf32, #tpu.memory_space<vmem>>) attributes {dimension_semantics = [#tpu.dimension_semantics<parallel>, #tpu.dimension_semantics<parallel>], iteration_bounds = array<i64: 1, 1>, scalar_prefetch = 0 : i64, scratch_operands = 0 : i64, tpu.core_type = #tpu.core_type<tc>, window_params = [{transform_indices = @transform_0, window_bounds = array<i64: 8, 2>}, {transform_indices = @transform_1, window_bounds = array<i64: 8, 256>}, {transform_indices = @transform_2, window_bounds = array<i64: 8, 256>}]} {
    %c0 = arith.constant 0 : index
    %c0_0 = arith.constant 0 : index
    %0 = vector.load %arg2[%c0, %c0_0] : memref<8x2xf32, #tpu.memory_space<vmem>>, vector<8x2xf32>
    %1 = vector.extract_strided_slice %0 {offsets = [0, 0], sizes = [8, 1], strides = [1, 1]} : vector<8x2xf32> to vector<8x1xf32>
    %2 = vector.extract_strided_slice %0 {offsets = [0, 1], sizes = [8, 1], strides = [1, 1]} : vector<8x2xf32> to vector<8x1xf32>
    %c0_1 = arith.constant 0 : index
    %c0_2 = arith.constant 0 : index
    %3 = vector.load %arg3[%c0_1, %c0_2] : memref<8x256xf32, #tpu.memory_space<vmem>>, vector<8x256xf32>
    %4 = vector.broadcast %1 : vector<8x1xf32> to vector<8x256xf32>
    %5 = arith.subf %3, %4 : vector<8x256xf32>
    %6 = vector.broadcast %2 : vector<8x1xf32> to vector<8x256xf32>
    %7 = arith.mulf %5, %6 : vector<8x256xf32>
    %c0_3 = arith.constant 0 : index
    %c0_4 = arith.constant 0 : index
    %8 = vector.load %arg4[%c0_3, %c0_4] : memref<8x256xf32, #tpu.memory_space<vmem>>, vector<8x256xf32>
    tpu.vector_store %arg4[%c0_3, %c0_4], %7 {strides = array<i32>} : memref<8x256xf32, #tpu.memory_space<vmem>>, vector<8x256xf32>,
    return
  }
  func.func @transform_0(%arg0: i32, %arg1: i32) -> (i32, i32) {
    %c0_i32 = arith.constant 0 : i32
    %c0_i32_0 = arith.constant 0 : i32
    return %arg0, %c0_i32 : i32, i32
  }
  func.func @transform_1(%arg0: i32, %arg1: i32) -> (i32, i32) {
    %c0_i32 = arith.constant 0 : i32
    return %arg0, %arg1 : i32, i32
  }
  func.func @transform_2(%arg0: i32, %arg1: i32) -> (i32, i32) {
    %c0_i32 = arith.constant 0 : i32
    return %arg0, %arg1 : i32, i32
  }
}

</mosaic_0001>

<bundles_post_ra>
// kernel: tpu_custom_call.1
= control target key start
LH: loop header
LB: loop body
LE: loop exit
PB: predicated region body
PF: predicated region fallthrough
CT: control target
= control target key end

     0   :  { %7 = vsyncpa [#allocation3], 0  ;;  %s157_s0 = inlined_call_operand.vmem [shape: f32[8,2], index: 0, kind: input, shape index: {}]   ;;  %s158_s1 = inlined_call_operand.hbm [shape: f32[8,256], index: 1, kind: input, shape index: {}]   ;;  %s159_s2 = inlined_call_operand.hbm [shape: f32[8,256], index: 2, kind: output, shape index: {}]  }
   0x1   :  { %8 = vsyncpa [#allocation4], 0  ;;  %s111_s9 = smov [#allocation2]   ;;  %s63_s13 = scalar_lea.hbm %s158_s1, 256 }
   0x2   :  { %s17_s10 = sshll.u32 %s111_s9, 4  ;;  %p64_p0 = scmp.ne.s32.totalorder %s158_s1, %s63_s13  ;;  %s18_s10 = int_to_ptr.vmem [resolvable:$true] %s17_s10 }
   0x3   :  { %p67_p1 = scmp.lt.u32.totalorder %s63_s13, %s158_s1 }
   0x5   :  { %p69_p2 = pnand %p67_p1, %p64_p0 }
   0x7   :  { %72 = shalt.err (!%p69_p2)
}
   0x8   :  { %s73_s18 = scalar_lea.vmem %s18_s10, 256  ;;  %p78_p4 = scmp.lt.s32.totalorder %s18_s10, %s18_s10 }
   0x9   :  { %p74_p3 = scmp.ne.s32.totalorder %s18_s10, %s73_s18  ;;  %p79_p5 = scmp.lt.s32.totalorder %s73_s18, %s73_s18 }
   0xb   :  { %p80_p6 = por %p79_p5, %p78_p4 }
   0xd   :  { %p81_p7 = pnand %p80_p6, %p74_p3 }
   0xf   :  { %84 = shalt.err (!%p81_p7)
}
  0x10   :  { %20 = dma.hbm_to_vmem [thread:$0]  %s158_s1, 256, %s18_s10, [#allocation3]  }
  0x11   :  { %107 = dma.done.wait [#allocation3], 256  }
  0x12   :  { %108 = vsyncadd [#allocation3], 4294967040  ;;  %v112_v0 = vmov 0   ;;  %v24_v1 = vld [vmem:[%s157_s0] sm:$0xff]  ;;  %v113_v2 = vmov 1   ;;  %v26_v5 = vld [vmem:[#allocation2 + $0x8] sm:$0xff] }
  0x13   :  { %61 = vset.pattern.permute.xlu0 %v112_v0  ;;  %v25_v4 = vld [vmem:[#allocation2] sm:$0xff]  ;;  %s114_s23 = smov [#allocation5]  }
  0x14   :  { %29 = vperm.xlu0 %61, %v24_v1   ;;  %s48_s24 = sshll.u32 %s114_s23, 4  ;;  %s49_s24 = int_to_ptr.vmem [resolvable:$true] %s48_s24 }
  0x15   :  { %s85_s1 = scalar_lea.vmem %s49_s24, 256  ;;  %p90_p9 = scmp.lt.s32.totalorder %s49_s24, %s49_s24 }
  0x16   :  { %p86_p8 = scmp.ne.s32.totalorder %s49_s24, %s85_s1  ;;  %p91_p10 = scmp.lt.s32.totalorder %s85_s1, %s85_s1 }
  0x18   :  { %62 = vset.pattern.permute.xlu0 %v113_v2  ;;  %p92_p11 = por %p91_p10, %p90_p9 }
  0x19   :  { %35 = vperm.xlu0 %62, %v24_v1  }
  0x1a   :  { %p93_p12 = pnand %p92_p11, %p86_p8 }
  0x93   :  { %v30_v3 = vpop.permute.xlu0 %29 }
  0x94   :  { %v32_v6 = vsub.f32 %v25_v4, %v30_v3  ;;  %v33_v7 = vsub.f32 %v26_v5, %v30_v3 }
  0x98   :  { %v36_v8 = vpop.permute.xlu0 %35 }
  0x99   :  { %v38_v9 = vmul.f32 %v36_v8, %v32_v6  ;;  %v39_v10 = vmul.f32 %v36_v8, %v33_v7 }
  0x9b   :  { %40 = vst [vmem:[#allocation5] sm:$0xff] %v38_v9  ;;  %41 = vst [vmem:[#allocation5 + $0x8] sm:$0xff] %v39_v10 }
  0x9c   :  { %96 = shalt.err (!%p93_p12)
}
  0x9d   :  { %s97_s26 = scalar_lea.hbm %s159_s2, 256 }
  0x9e   :  { %p98_p13 = scmp.ne.s32.totalorder %s159_s2, %s97_s26  ;;  %p101_p0 = scmp.lt.u32.totalorder %s97_s26, %s159_s2 }
  0xa0   :  { %p103_p1 = pnand %p101_p0, %p98_p13 }
  0xa2   :  { %106 = shalt.err (!%p103_p1)
}
  0xa3   :  { %51 = dma.vmem_to_hbm [thread:$0]  %s49_s24, 256, %s159_s2, [#allocation4]  }
  0xa4   :  { %109 = dma.done.wait [#allocation4], 256  }
  0xa5   :  { %110 = vsyncadd [#allocation4], 4294967040 }
  0xa6   :  { %55 = vsyncpa [#allocation3], 1 }
  0xa7   :  { %56 = vsyncpa [#allocation4], 1 }

</bundles_post_ra>
